<compile_context>
chip_gen: v7x
topology: tpu7x:2x2x1
jax: 0.10.0
libtpu: 0.0.40
codegen_flags: <defaults>
</compile_context>

<pallas_src>
import functools

import jax
import jax.numpy as jnp
from jax.experimental import pallas as pl
from jax.experimental.pallas import tpu as pltpu


def _round_up(x, m):
    return (x + m - 1) // m * m


# ----------------------------------------------------------------------------
# Kernel
# ----------------------------------------------------------------------------
def mlp_kernel(x_ref,
               w1_ref, w2_ref, w3_ref, w4_ref, w5_ref,
               b_ref, o_ref, *, epi_dtype):
    """x_ref: (TM, D_in) bf16; w*: bf16, lane-padded to 128-multiples;
    b_ref: (8, 256) f32 stacked biases (row i = bias of layer i, zero-padded);
    o_ref: (TM, 128) bf16.  Matmuls accumulate in f32; bias/ReLU run in
    `epi_dtype` (bf16 on v6e/v7x, f32 on v5e)."""
    b = b_ref[...].astype(epi_dtype)   # tiny (8,256) cast, once per grid step

    def layer(h, w_ref, row, relu):
        acc = jnp.dot(h, w_ref[...], preferred_element_type=jnp.float32)
        acc = acc.astype(epi_dtype) + b[row:row + 1, :acc.shape[-1]]
        if relu:
            acc = jnp.maximum(acc, 0.0)
        return acc

    h = layer(x_ref[...], w1_ref, 0, True).astype(jnp.bfloat16)
    h = layer(h, w2_ref, 1, True).astype(jnp.bfloat16)
    h = layer(h, w3_ref, 2, True).astype(jnp.bfloat16)
    h = layer(h, w4_ref, 3, True).astype(jnp.bfloat16)
    o_ref[...] = layer(h, w5_ref, 4, False).astype(o_ref.dtype)


# ----------------------------------------------------------------------------
# Parameter init / packing (done once, outside the kernel)
# ----------------------------------------------------------------------------
def init_params(key, in_features):
    """Deterministic init mimicking nn.Linear default (uniform +/- 1/sqrt(fan_in)).
    Weights stored as (in, out) so the kernel computes y = x @ W + b."""
    dims = [in_features, 50, 100, 150, 200, 6]
    params = []
    for i in range(5):
        fan_in, fan_out = dims[i], dims[i + 1]
        key, kw, kb = jax.random.split(key, 3)
        bound = 1.0 / jnp.sqrt(jnp.float32(fan_in))
        w = jax.random.uniform(kw, (fan_in, fan_out), jnp.float32, -bound, bound)
        b = jax.random.uniform(kb, (fan_out,), jnp.float32, -bound, bound)
        params.append((w, b))
    return params


def pack_params(params):
    """Zero-pad weight output dims to 128-multiples (input dim of layer 1 kept
    as-is, per review).  Returns bf16 padded weights and a stacked
    (8, max_width) f32 bias array."""
    in_features = params[0][0].shape[0]
    dims_pad = [in_features] + [_round_up(w.shape[1], 128) for w, _ in params]
    max_out = max(dims_pad[1:])
    ws = []
    bias = jnp.zeros((8, max_out), jnp.float32)       # sublane-padded to 8 rows
    for i, (w, b) in enumerate(params):
        wp = jnp.zeros((dims_pad[i], dims_pad[i + 1]), jnp.float32)
        wp = wp.at[:w.shape[0], :w.shape[1]].set(w)
        ws.append(wp.astype(jnp.bfloat16))
        bias = bias.at[i, :b.shape[0]].set(b)
    return ws, bias


def epilogue_dtype_for_device():
    """bf16 epilogue on bf16-VPU chips (v6e/v7x); f32 on v5e and older."""
    try:
        kind = jax.devices()[0].device_kind.lower()
    except Exception:
        return jnp.float32
    if any(tag in kind for tag in ("v2", "v3", "v4", "v5")):
        return jnp.float32
    return jnp.bfloat16


# ----------------------------------------------------------------------------
# pallas_call wrapper
# ----------------------------------------------------------------------------
@functools.partial(jax.jit, static_argnames=("block_m", "epilogue_dtype"))
def mlp_forward_padded(x, ws, bias, *, block_m=128, epilogue_dtype=jnp.bfloat16):
    """Runs the fused MLP.  Returns the lane/batch-padded (batch_p, 128) bf16
    output; real result lives in [:batch, :6].  Performance-sensitive callers
    should consume this padded buffer directly (slicing re-reads the output)."""
    in_features = ws[0].shape[0]
    n_out_pad = ws[-1].shape[1]

    x2 = x.reshape(-1, in_features)
    batch = x2.shape[0]

    # Adaptive batch tiling:
    #  * at least cdiv(batch, block_m) tiles,
    #  * at least 2 tiles once batch >= 256 so v7x's two TCs both get work,
    #  * tm rounded to 16 rows (bf16 sublane packing) -> padding waste is small.
    min_tiles = 2 if batch >= 256 else 1
    num_tiles = max(pl.cdiv(batch, block_m), min_tiles)
    tm = _round_up(pl.cdiv(batch, num_tiles), 16)
    batch_p = num_tiles * tm

    if batch_p != batch:
        x2 = jnp.pad(x2, ((0, batch_p - batch), (0, 0)))
    x2 = x2.astype(jnp.bfloat16)

    grid = (num_tiles,)
    w_specs = [pl.BlockSpec(w.shape, lambda i: (0, 0)) for w in ws]  # resident

    flops = 2 * batch_p * sum(w.shape[0] * w.shape[1] for w in ws)
    bytes_accessed = (x2.size * 2 + sum(w.size for w in ws) * 2
                      + bias.size * 4 + batch_p * n_out_pad * 2)

    kernel = functools.partial(mlp_kernel, epi_dtype=epilogue_dtype)

    out = pl.pallas_call(
        kernel,
        out_shape=jax.ShapeDtypeStruct((batch_p, n_out_pad), jnp.bfloat16),
        grid_spec=pltpu.PrefetchScalarGridSpec(
            num_scalar_prefetch=0,
            grid=grid,
            in_specs=[pl.BlockSpec((tm, in_features), lambda i: (i, 0))]
                     + w_specs
                     + [pl.BlockSpec(bias.shape, lambda i: (0, 0))],
            out_specs=pl.BlockSpec((tm, n_out_pad), lambda i: (i, 0)),
        ),
        compiler_params=pltpu.CompilerParams(
            dimension_semantics=("parallel",)),
        cost_estimate=pl.CostEstimate(
            flops=flops, transcendentals=0, bytes_accessed=bytes_accessed),
    )(x2, *ws, bias)
    return out


def mlp_forward(x, ws, bias, *, out_features=6, block_m=128,
                epilogue_dtype=jnp.bfloat16):
    """Convenience wrapper: logical (batch, out_features) f32 result.
    (The slice is a separate XLA op re-reading the padded output; use
    mlp_forward_padded directly when benchmarking / fusing downstream.)"""
    batch = x.reshape(-1, ws[0].shape[0]).shape[0]
    out_p = mlp_forward_padded(x, ws, bias, block_m=block_m,
                               epilogue_dtype=epilogue_dtype)
    return out_p[:batch, :out_features].astype(jnp.float32)


# ----------------------------------------------------------------------------
# Pure-JAX reference mirroring the kernel's dtype schedule
# ----------------------------------------------------------------------------
def mlp_reference(x, params, epi_dtype):
    h = x.reshape(-1, params[0][0].shape[0]).astype(jnp.bfloat16)
    for i, (w, b) in enumerate(params):
        acc = jnp.dot(h, w.astype(jnp.bfloat16),
                      preferred_element_type=jnp.float32)
        acc = acc.astype(epi_dtype) + b.astype(epi_dtype)
        if i < 4:
            acc = jnp.maximum(acc, 0.0)
        h = acc.astype(jnp.bfloat16)
    return h.astype(jnp.float32)


if __name__ == "__main__":
    # Small shapes consistent with the module: group=4, feature=8 -> in=32, out=6
    group, feature = 4, 8
    key = jax.random.PRNGKey(0)
    key, kx1, kx2 = jax.random.split(key, 3)

    params = init_params(key, group * feature)
    ws, bias = pack_params(params)
    epi = epilogue_dtype_for_device()

    # Test 1: tiny batch (single grid step).
    x_small = jax.random.normal(kx1, (8, group, feature), jnp.float32)
    out_small = jax.block_until_ready(
        mlp_forward(x_small, ws, bias, out_features=6, epilogue_dtype=epi))
    ref_small = mlp_reference(x_small, params, epi)
    assert out_small.shape == (8, 6)
    assert jnp.allclose(out_small, ref_small, atol=3e-2, rtol=3e-2)

    # Test 2: batch that exercises multi-step grid, batch padding and the
    # megacore split heuristic (batch=300 -> 3 tiles of 112 rows).
    x_big = jax.random.normal(kx2, (300, group, feature), jnp.float32)
    out_big = jax.block_until_ready(
        mlp_forward(x_big, ws, bias, out_features=6, epilogue_dtype=epi))
    ref_big = mlp_reference(x_big, params, epi)
    assert out_big.shape == (300, 6)
    assert jnp.allclose(out_big, ref_big, atol=3e-2, rtol=3e-2)

    print("KERNEL_OK")
</pallas_src>

<mosaic_0001>
module attributes {stable_mosaic.version = 11 : i64} {
  func.func @mlp_kernel(%arg0: i32, %arg1: memref<16x32xbf16, #tpu.memory_space<vmem>>, %arg2: memref<32x128xbf16, #tpu.memory_space<vmem>>, %arg3: memref<128x128xbf16, #tpu.memory_space<vmem>>, %arg4: memref<128x256xbf16, #tpu.memory_space<vmem>>, %arg5: memref<256x256xbf16, #tpu.memory_space<vmem>>, %arg6: memref<256x128xbf16, #tpu.memory_space<vmem>>, %arg7: memref<8x256xf32, #tpu.memory_space<vmem>>, %arg8: memref<16x128xbf16, #tpu.memory_space<vmem>>) attributes {dimension_semantics = [#tpu.dimension_semantics<parallel>], iteration_bounds = array<i64: 1>, scalar_prefetch = 0 : i64, scratch_operands = 0 : i64, tpu.core_type = #tpu.core_type<tc>, window_params = [{transform_indices = @transform_0, window_bounds = array<i64: 16, 32>}, {pipeline_mode = #tpu.pipeline_mode<synchronous>, transform_indices = @transform_1, window_bounds = array<i64: 32, 128>}, {pipeline_mode = #tpu.pipeline_mode<synchronous>, transform_indices = @transform_2, window_bounds = array<i64: 128, 128>}, {pipeline_mode = #tpu.pipeline_mode<synchronous>, transform_indices = @transform_3, window_bounds = array<i64: 128, 256>}, {pipeline_mode = #tpu.pipeline_mode<synchronous>, transform_indices = @transform_4, window_bounds = array<i64: 256, 256>}, {pipeline_mode = #tpu.pipeline_mode<synchronous>, transform_indices = @transform_5, window_bounds = array<i64: 256, 128>}, {pipeline_mode = #tpu.pipeline_mode<synchronous>, transform_indices = @transform_6, window_bounds = array<i64: 8, 256>}, {transform_indices = @transform_7, window_bounds = array<i64: 16, 128>}]} {
    %c0 = arith.constant 0 : index
    %c0_0 = arith.constant 0 : index
    %0 = vector.load %arg7[%c0, %c0_0] : memref<8x256xf32, #tpu.memory_space<vmem>>, vector<8x256xf32>
    %1 = arith.truncf %0 : vector<8x256xf32> to vector<8x256xbf16>
    %c0_1 = arith.constant 0 : index
    %c0_2 = arith.constant 0 : index
    %2 = vector.load %arg1[%c0_1, %c0_2] : memref<16x32xbf16, #tpu.memory_space<vmem>>, vector<16x32xbf16>
    %c0_3 = arith.constant 0 : index
    %c0_4 = arith.constant 0 : index
    %3 = vector.load %arg2[%c0_3, %c0_4] : memref<32x128xbf16, #tpu.memory_space<vmem>>, vector<32x128xbf16>
    %cst = arith.constant dense<0.000000e+00> : vector<16x128xf32>
    %4 = tpu.matmul %2, %3, %cst {dimension_numbers = #tpu.dot_dimension_numbers<[1], [0], [0], [1], [0, 0, 1, 1], [], []>} : vector<16x32xbf16>, vector<32x128xbf16>, vector<16x128xf32> -> vector<16x128xf32>
    %5 = arith.truncf %4 : vector<16x128xf32> to vector<16x128xbf16>
    %6 = vector.extract_strided_slice %1 {offsets = [0, 0], sizes = [1, 128], strides = [1, 1]} : vector<8x256xbf16> to vector<1x128xbf16>
    %7 = vector.broadcast %6 : vector<1x128xbf16> to vector<16x128xbf16>
    %8 = arith.addf %5, %7 : vector<16x128xbf16>
    %cst_5 = arith.constant 0.000000e+00 : bf16
    %9 = vector.broadcast %cst_5 : bf16 to vector<16x128xbf16>
    %10 = arith.maximumf %8, %9 : vector<16x128xbf16>
    %c0_6 = arith.constant 0 : index
    %c0_7 = arith.constant 0 : index
    %11 = vector.load %arg3[%c0_6, %c0_7] : memref<128x128xbf16, #tpu.memory_space<vmem>>, vector<128x128xbf16>
    %cst_8 = arith.constant dense<0.000000e+00> : vector<16x128xf32>
    %12 = tpu.matmul %10, %11, %cst_8 {dimension_numbers = #tpu.dot_dimension_numbers<[1], [0], [0], [1], [0, 0, 1, 1], [], []>} : vector<16x128xbf16>, vector<128x128xbf16>, vector<16x128xf32> -> vector<16x128xf32>
    %13 = arith.truncf %12 : vector<16x128xf32> to vector<16x128xbf16>
    %14 = vector.extract_strided_slice %1 {offsets = [1, 0], sizes = [1, 128], strides = [1, 1]} : vector<8x256xbf16> to vector<1x128xbf16>
    %15 = vector.broadcast %14 : vector<1x128xbf16> to vector<16x128xbf16>
    %16 = arith.addf %13, %15 : vector<16x128xbf16>
    %cst_9 = arith.constant 0.000000e+00 : bf16
    %17 = vector.broadcast %cst_9 : bf16 to vector<16x128xbf16>
    %18 = arith.maximumf %16, %17 : vector<16x128xbf16>
    %c0_10 = arith.constant 0 : index
    %c0_11 = arith.constant 0 : index
    %19 = vector.load %arg4[%c0_10, %c0_11] : memref<128x256xbf16, #tpu.memory_space<vmem>>, vector<128x256xbf16>
    %cst_12 = arith.constant dense<0.000000e+00> : vector<16x256xf32>
    %20 = tpu.matmul %18, %19, %cst_12 {dimension_numbers = #tpu.dot_dimension_numbers<[1], [0], [0], [1], [0, 0, 1, 1], [], []>} : vector<16x128xbf16>, vector<128x256xbf16>, vector<16x256xf32> -> vector<16x256xf32>
    %21 = arith.truncf %20 : vector<16x256xf32> to vector<16x256xbf16>
    %22 = vector.extract_strided_slice %1 {offsets = [2, 0], sizes = [1, 256], strides = [1, 1]} : vector<8x256xbf16> to vector<1x256xbf16>
    %23 = vector.broadcast %22 : vector<1x256xbf16> to vector<16x256xbf16>
    %24 = arith.addf %21, %23 : vector<16x256xbf16>
    %cst_13 = arith.constant 0.000000e+00 : bf16
    %25 = vector.broadcast %cst_13 : bf16 to vector<16x256xbf16>
    %26 = arith.maximumf %24, %25 : vector<16x256xbf16>
    %c0_14 = arith.constant 0 : index
    %c0_15 = arith.constant 0 : index
    %27 = vector.load %arg5[%c0_14, %c0_15] : memref<256x256xbf16, #tpu.memory_space<vmem>>, vector<256x256xbf16>
    %cst_16 = arith.constant dense<0.000000e+00> : vector<16x256xf32>
    %28 = tpu.matmul %26, %27, %cst_16 {dimension_numbers = #tpu.dot_dimension_numbers<[1], [0], [0], [1], [0, 0, 1, 1], [], []>} : vector<16x256xbf16>, vector<256x256xbf16>, vector<16x256xf32> -> vector<16x256xf32>
    %29 = arith.truncf %28 : vector<16x256xf32> to vector<16x256xbf16>
    %30 = vector.extract_strided_slice %1 {offsets = [3, 0], sizes = [1, 256], strides = [1, 1]} : vector<8x256xbf16> to vector<1x256xbf16>
    %31 = vector.broadcast %30 : vector<1x256xbf16> to vector<16x256xbf16>
    %32 = arith.addf %29, %31 : vector<16x256xbf16>
    %cst_17 = arith.constant 0.000000e+00 : bf16
    %33 = vector.broadcast %cst_17 : bf16 to vector<16x256xbf16>
    %34 = arith.maximumf %32, %33 : vector<16x256xbf16>
    %c0_18 = arith.constant 0 : index
    %c0_19 = arith.constant 0 : index
    %35 = vector.load %arg6[%c0_18, %c0_19] : memref<256x128xbf16, #tpu.memory_space<vmem>>, vector<256x128xbf16>
    %cst_20 = arith.constant dense<0.000000e+00> : vector<16x128xf32>
    %36 = tpu.matmul %34, %35, %cst_20 {dimension_numbers = #tpu.dot_dimension_numbers<[1], [0], [0], [1], [0, 0, 1, 1], [], []>} : vector<16x256xbf16>, vector<256x128xbf16>, vector<16x128xf32> -> vector<16x128xf32>
    %37 = arith.truncf %36 : vector<16x128xf32> to vector<16x128xbf16>
    %38 = vector.extract_strided_slice %1 {offsets = [4, 0], sizes = [1, 128], strides = [1, 1]} : vector<8x256xbf16> to vector<1x128xbf16>
    %39 = vector.broadcast %38 : vector<1x128xbf16> to vector<16x128xbf16>
    %40 = arith.addf %37, %39 : vector<16x128xbf16>
    %c0_21 = arith.constant 0 : index
    %c0_22 = arith.constant 0 : index
    %41 = vector.load %arg8[%c0_21, %c0_22] : memref<16x128xbf16, #tpu.memory_space<vmem>>, vector<16x128xbf16>
    tpu.vector_store %arg8[%c0_21, %c0_22], %40 {strides = array<i32>} : memref<16x128xbf16, #tpu.memory_space<vmem>>, vector<16x128xbf16>,
    return
  }
  func.func @transform_0(%arg0: i32) -> (i32, i32) {
    %c0_i32 = arith.constant 0 : i32
    %c0_i32_0 = arith.constant 0 : i32
    return %arg0, %c0_i32 : i32, i32
  }
  func.func @transform_1(%arg0: i32) -> (i32, i32) {
    %c0_i32 = arith.constant 0 : i32
    %c0_i32_0 = arith.constant 0 : i32
    %c0_i32_1 = arith.constant 0 : i32
    return %c0_i32, %c0_i32_0 : i32, i32
  }
  func.func @transform_2(%arg0: i32) -> (i32, i32) {
    %c0_i32 = arith.constant 0 : i32
    %c0_i32_0 = arith.constant 0 : i32
    %c0_i32_1 = arith.constant 0 : i32
    return %c0_i32, %c0_i32_0 : i32, i32
  }
  func.func @transform_3(%arg0: i32) -> (i32, i32) {
    %c0_i32 = arith.constant 0 : i32
    %c0_i32_0 = arith.constant 0 : i32
    %c0_i32_1 = arith.constant 0 : i32
    return %c0_i32, %c0_i32_0 : i32, i32
  }
  func.func @transform_4(%arg0: i32) -> (i32, i32) {
    %c0_i32 = arith.constant 0 : i32
    %c0_i32_0 = arith.constant 0 : i32
    %c0_i32_1 = arith.constant 0 : i32
    return %c0_i32, %c0_i32_0 : i32, i32
  }
  func.func @transform_5(%arg0: i32) -> (i32, i32) {
    %c0_i32 = arith.constant 0 : i32
    %c0_i32_0 = arith.constant 0 : i32
    %c0_i32_1 = arith.constant 0 : i32
    return %c0_i32, %c0_i32_0 : i32, i32
  }
  func.func @transform_6(%arg0: i32) -> (i32, i32) {
    %c0_i32 = arith.constant 0 : i32
    %c0_i32_0 = arith.constant 0 : i32
    %c0_i32_1 = arith.constant 0 : i32
    return %c0_i32, %c0_i32_0 : i32, i32
  }
  func.func @transform_7(%arg0: i32) -> (i32, i32) {
    %c0_i32 = arith.constant 0 : i32
    %c0_i32_0 = arith.constant 0 : i32
    return %arg0, %c0_i32 : i32, i32
  }
}

</mosaic_0001>

<bundles_post_ra>
// kernel: mlp_forward_padded.1
= control target key start
LH: loop header
LB: loop body
LE: loop exit
PB: predicated region body
PF: predicated region fallthrough
CT: control target
= control target key end

     0   :  { %12 = vsyncpa [#allocation3], 0  ;;  %s1401_s0 = inlined_call_operand.vmem [shape: bf16[16,32], index: 0, kind: input, shape index: {}]   ;;  %s1402_s1 = inlined_call_operand.vmem [shape: bf16[32,128], index: 1, kind: input, shape index: {}]   ;;  %s1403_s2 = inlined_call_operand.vmem [shape: bf16[128,128], index: 2, kind: input, shape index: {}]   ;;  %s1404_s3 = inlined_call_operand.hbm [shape: bf16[128,256], index: 3, kind: input, shape index: {}]   ;;  %s1405_s4 = inlined_call_operand.hbm [shape: bf16[256,256], index: 4, kind: input, shape index: {}]   ;;  %s1406_s5 = inlined_call_operand.hbm [shape: bf16[256,128], index: 5, kind: input, shape index: {}]   ;;  %s1407_s6 = inlined_call_operand.vmem [shape: f32[8,256], index: 6, kind: input, shape index: {}]   ;;  %s1408_s7 = inlined_call_operand.hbm [shape: bf16[16,128], index: 7, kind: output, shape index: {}]  }
   0x1   :  { %13 = vsyncpa [#allocation6], 0 }
   0x2   :  { %14 = vsyncpa [#allocation4], 0  ;;  %s1220_s24 = smov [#allocation5]   ;;  %s1221_s26 = smov [#allocation2]  }
   0x3   :  { %s38_s25 = sshll.u32 %s1220_s24, 4  ;;  %s26_s27 = sshll.u32 %s1221_s26, 4  ;;  %s39_s25 = int_to_ptr.vmem [resolvable:$true] %s38_s25  ;;  %s1271_s27 = int_to_ptr.vmem [resolvable:$true] %s26_s27 }
   0x4   :  { %s1126_s30 = scalar_lea.hbm %s1405_s4, 4096 }
   0x5   :  { %p1127_p0 = scmp.ne.s32.totalorder %s1405_s4, %s1126_s30  ;;  %p1130_p1 = scmp.lt.u32.totalorder %s1126_s30, %s1405_s4 }
   0x7   :  { %p1132_p2 = pnand %p1130_p1, %p1127_p0 }
   0x9   :  { %1135 = shalt.err (!%p1132_p2)
}
   0xa   :  { %s1136_s12 = scalar_lea.vmem %s39_s25, 4096  ;;  %p1141_p4 = scmp.lt.s32.totalorder %s39_s25, %s39_s25 }
   0xb   :  { %p1137_p3 = scmp.ne.s32.totalorder %s39_s25, %s1136_s12  ;;  %p1142_p5 = scmp.lt.s32.totalorder %s1136_s12, %s1136_s12 }
   0xd   :  { %p1143_p6 = por %p1142_p5, %p1141_p4 }
   0xf   :  { %p1144_p7 = pnand %p1143_p6, %p1137_p3 }
  0x11   :  { %1147 = shalt.err (!%p1144_p7)
}
  0x12   :  { %s1222_s13 = smov 128   ;;  %s1223_s14 = smov 8  }
  0x13   :  { %44 = dma.hbm_to_vmem [thread:$0]  %s1405_s4, 4096, %s39_s25, [#allocation6], %s1222_s13, %s1222_s13, %s1223_s14  }
  0x14   :  { %s1148_s19 = scalar_lea.hbm %s1404_s3, 2048 }
  0x15   :  { %p1149_p8 = scmp.ne.s32.totalorder %s1404_s3, %s1148_s19  ;;  %p1152_p9 = scmp.lt.u32.totalorder %s1148_s19, %s1404_s3 }
  0x17   :  { %p1154_p10 = pnand %p1152_p9, %p1149_p8 }
  0x19   :  { %1157 = shalt.err (!%p1154_p10)
}
  0x1a   :  { %s1158_s24 = scalar_lea.vmem %s1271_s27, 2048  ;;  %p1163_p12 = scmp.lt.s32.totalorder %s1271_s27, %s1271_s27 }
  0x1b   :  { %p1159_p11 = scmp.ne.s32.totalorder %s1271_s27, %s1158_s24  ;;  %p1164_p13 = scmp.lt.s32.totalorder %s1158_s24, %s1158_s24 }
  0x1d   :  { %p1165_p0 = por %p1164_p13, %p1163_p12 }
  0x1f   :  { %p1166_p1 = pnand %p1165_p0, %p1159_p11 }
  0x21   :  { %1169 = shalt.err (!%p1166_p1)
}
  0x22   :  { %32 = dma.hbm_to_vmem [thread:$0]  %s1404_s3, 2048, %s1271_s27, [#allocation3], %s1222_s13, %s1222_s13, %s1223_s14  }
  0x23   :  { %s1224_s26 = smov [#allocation7]   ;;  %s1170_s8 = scalar_lea.hbm %s1406_s5, 2048 }
  0x24   :  { %s50_s28 = sshll.u32 %s1224_s26, 4  ;;  %p1171_p2 = scmp.ne.s32.totalorder %s1406_s5, %s1170_s8  ;;  %s51_s28 = int_to_ptr.vmem [resolvable:$true] %s50_s28 }
  0x25   :  { %p1174_p3 = scmp.lt.u32.totalorder %s1170_s8, %s1406_s5 }
  0x27   :  { %p1176_p4 = pnand %p1174_p3, %p1171_p2 }
  0x29   :  { %1179 = shalt.err (!%p1176_p4)
}
  0x2a   :  { %s1180_s15 = scalar_lea.vmem %s51_s28, 2048  ;;  %p1185_p6 = scmp.lt.s32.totalorder %s51_s28, %s51_s28 }
  0x2b   :  { %p1181_p5 = scmp.ne.s32.totalorder %s51_s28, %s1180_s15  ;;  %p1186_p7 = scmp.lt.s32.totalorder %s1180_s15, %s1180_s15 }
  0x2d   :  { %p1187_p8 = por %p1186_p7, %p1185_p6 }
  0x2f   :  { %p1188_p9 = pnand %p1187_p8, %p1181_p5 }
  0x31   :  { %1191 = shalt.err (!%p1188_p9)
}
  0x32   :  { %s1225_s3 = smov 64   ;;  %s1226_s27 = smov 4  }
  0x33   :  { %56 = dma.hbm_to_vmem [thread:$0]  %s1406_s5, 2048, %s51_s28, [#allocation6], %s1225_s3, %s1225_s3, %s1226_s27  }
  0x34   :  { %1214 = dma.done.wait [#allocation3], 2048  }
  0x35   :  { %1215 = vsyncadd [#allocation3], 4294965248 }
  0x36   :  { %1216 = dma.done.wait [#allocation6], 6144  }
  0x37   :  { %1217 = vsyncadd [#allocation6], 4294961152  ;;  %v1227_v0 = vmov 0.0   ;;  %vm1228_vm0 = vmmov 0   ;;  %v1027_v1 = vld [vmem:[%s1402_s1] sm:$0xff]   ;;  %v1028_v2 = vld [vmem:[%s1402_s1 + $0x8] sm:$0xff]   ;;  %v145_v25 = vlaneseq }
  0x38   :  { %988 = vmatprep.subr.bf16.mxu0 %v1227_v0  ;;  %992 = vmatprep.mubr.msk.bf16.mxu0 %vm1228_vm0, %v1227_v0  ;;  %v1030_v3 = vld [vmem:[%s1403_s2] sm:$0xff]   ;;  %v1031_v5 = vld [vmem:[%s1403_s2 + $0x8] sm:$0xff]   ;;  %vm96_vm1 = vcmask 261120   ;;  %v1032_v6 = vld [vmem:[%s1403_s2 + $0x10] sm:$0xff]   ;;  %v1229_v12 = vmov 0  }
  0x39   :  { %996 = vmatprep.subr.bf16.mxu1 %v1227_v0  ;;  %1012 = vmatprep.mubr.msk.bf16.mxu1 %vm1228_vm0, %v1227_v0  ;;  %v1029_v4 = vld [vmem:[%s1401_s0] sm:$0xff]   ;;  %v1033_v7 = vld [vmem:[%s1403_s2 + $0x18] sm:$0xff]   ;;  %v1035_v9 = vld [vmem:[%s1403_s2 + $0x28] sm:$0xff]   ;;  %v1356_v28 = vshrl.u32 %v145_v25, 7 }
  0x3a   :  { %989 = vmatpush3.bf16.msra.mxu0 %v1027_v1  ;;  %997 = vmatpush3.bf16.msra.mxu1 %v1030_v3  ;;  %v1034_v8 = vld [vmem:[%s1403_s2 + $0x20] sm:$0xff]   ;;  %v1036_v10 = vld [vmem:[%s1403_s2 + $0x30] sm:$0xff]   ;;  %v1037_v11 = vld [vmem:[%s1403_s2 + $0x38] sm:$0xff]  }
  0x3b   :  { %990 = vmatprep.subr.bf16.mxu0 %v1227_v0  ;;  %998 = vmatprep.subr.bf16.mxu1 %v1227_v0  ;;  %v1038_v13 = vld [vmem:[#allocation2] ss:$8 sps:$4 sm:$0xff]   ;;  %v1040_v14 = vld [vmem:[#allocation2 + $0x4] ss:$8 sps:$4 sm:$0xff]   ;;  %v1043_v15 = vld [vmem:[#allocation2 + $0x14] ss:$8 sps:$4 sm:$0xff]  }
  0x3c   :  { %v1041_v16 = vld [vmem:[#allocation2 + $0x10] ss:$8 sps:$4 sm:$0xff]   ;;  %v1046_v17 = vld [vmem:[#allocation2 + $0x24] ss:$8 sps:$4 sm:$0xff]   ;;  %v1044_v18 = vld [vmem:[#allocation2 + $0x20] ss:$8 sps:$4 sm:$0xff]  }
  0x3d   :  { %v1049_v19 = vld [vmem:[#allocation2 + $0x34] ss:$8 sps:$4 sm:$0xff]   ;;  %v1047_v20 = vld [vmem:[#allocation2 + $0x30] ss:$8 sps:$4 sm:$0xff]   ;;  %v1052_v21 = vld [vmem:[#allocation2 + $0x44] ss:$8 sps:$4 sm:$0xff]  }
  0x3e   :  { %991 = vmatpush3.bf16.msra.mxu0 %v1028_v2  ;;  %999 = vmatpush3.bf16.msra.mxu1 %v1031_v5  ;;  %v1050_v22 = vld [vmem:[#allocation2 + $0x40] ss:$8 sps:$4 sm:$0xff]   ;;  %v1055_v23 = vld [vmem:[#allocation2 + $0x54] ss:$8 sps:$4 sm:$0xff]   ;;  %v1053_v24 = vld [vmem:[#allocation2 + $0x50] ss:$8 sps:$4 sm:$0xff]  }
  0x3f   :  { %1000 = vmatprep.subr.bf16.mxu1 %v1227_v0  ;;  %362 = vmatprep.subr.bf16.mxu0 %v1040_v14  ;;  %v69_v26 = vld [vmem:[%s1407_s6] sm:$0xff]  ;;  %v147_v30 = vsub.s32 0, %v1356_v28  ;;  %v1061_v41 = vld [vmem:[#allocation2 + $0x74] ss:$8 sps:$4 sm:$0xff]   ;;  %v1059_v42 = vld [vmem:[#allocation2 + $0x70] ss:$8 sps:$4 sm:$0xff]  }
  0x40   :  { %v1354_v27 = vpack.c.bf16 %v69_v26, %v69_v26  ;;  %v1058_v39 = vld [vmem:[#allocation2 + $0x64] ss:$8 sps:$4 sm:$0xff]   ;;  %v1056_v40 = vld [vmem:[#allocation2 + $0x60] ss:$8 sps:$4 sm:$0xff]   ;;  %v1067_v45 = vld [vmem:[#allocation5 + $0x14] ss:$8 sps:$4 sm:$0xff]  }
  0x41   :  { %993 = vmatmul.mubr.msk.bf16.vlgmr.msra.gmra.mrb[0].mxu0 %vm96_vm1, %v1029_v4  ;;  %v1062_v43 = vld [vmem:[#allocation5] ss:$8 sps:$4 sm:$0xff]   ;;  %v1064_v44 = vld [vmem:[#allocation5 + $0x4] ss:$8 sps:$4 sm:$0xff]   ;;  %v1065_v46 = vld [vmem:[#allocation5 + $0x10] ss:$8 sps:$4 sm:$0xff]  }
  0x42   :  { %1001 = vmatpush3.bf16.msra.mxu1 %v1032_v6  ;;  %394 = vmatprep.mubr.bf16.mxu0 %v1229_v12  ;;  %v1360_v29 = vpack.i.b16 %v1354_v27, %v1354_v27  ;;  %v1070_v47 = vld [vmem:[#allocation5 + $0x24] ss:$8 sps:$4 sm:$0xff]   ;;  %v1068_v48 = vld [vmem:[#allocation5 + $0x20] ss:$8 sps:$4 sm:$0xff]   ;;  %v1073_v49 = vld [vmem:[#allocation5 + $0x34] ss:$8 sps:$4 sm:$0xff]  }
  0x43   :  { %1002 = vmatprep.subr.bf16.mxu1 %v1227_v0  ;;  %363 = vmatpush1.bf16.msra.mxu0 %v1038_v13  ;;  %v1071_v50 = vld [vmem:[#allocation5 + $0x30] ss:$8 sps:$4 sm:$0xff]   ;;  %v1076_v51 = vld [vmem:[#allocation5 + $0x44] ss:$8 sps:$4 sm:$0xff]   ;;  %v1074_v52 = vld [vmem:[#allocation5 + $0x40] ss:$8 sps:$4 sm:$0xff]  }
  0x44   :  { %364 = vmatprep.subr.bf16.mxu0 %v1043_v15  ;;  %v148_v33 = vrot.slane %v1360_v29, %v147_v30  ;;  %v1079_v53 = vld [vmem:[#allocation5 + $0x54] ss:$8 sps:$4 sm:$0xff]   ;;  %v1077_v54 = vld [vmem:[#allocation5 + $0x50] ss:$8 sps:$4 sm:$0xff]   ;;  %v1082_v55 = vld [vmem:[#allocation5 + $0x64] ss:$8 sps:$4 sm:$0xff]  }
  0x45   :  { %v1080_v56 = vld [vmem:[#allocation5 + $0x60] ss:$8 sps:$4 sm:$0xff]   ;;  %v1085_v57 = vld [vmem:[#allocation5 + $0x74] ss:$8 sps:$4 sm:$0xff]   ;;  %v1083_v58 = vld [vmem:[#allocation5 + $0x70] ss:$8 sps:$4 sm:$0xff]  }
  0x46   :  { %1003 = vmatpush3.bf16.msra.mxu1 %v1033_v7  ;;  %v1088_v59 = vld [vmem:[#allocation5 + $0x84] ss:$8 sps:$4 sm:$0xff]   ;;  %v1086_v60 = vld [vmem:[#allocation5 + $0x80] ss:$8 sps:$4 sm:$0xff]   ;;  %v1091_v61 = vld [vmem:[#allocation5 + $0x94] ss:$8 sps:$4 sm:$0xff]  }
  0x47   :  { %1004 = vmatprep.subr.bf16.mxu1 %v1227_v0  ;;  %365 = vmatpush1.bf16.msra.mxu0 %v1041_v16  ;;  %v1089_v62 = vld [vmem:[#allocation5 + $0x90] ss:$8 sps:$4 sm:$0xff]   ;;  %v1094_v63 = vld [vmem:[#allocation5 + $0xa4] ss:$8 sps:$4 sm:$0xff]   ;;  %v1097_v1 = vld [vmem:[#allocation5 + $0xb4] ss:$8 sps:$4 sm:$0xff]  }
  0x48   :  { %366 = vmatprep.subr.bf16.mxu0 %v1046_v17  ;;  %v1095_v2 = vld [vmem:[#allocation5 + $0xb0] ss:$8 sps:$4 sm:$0xff]   ;;  %v1100_v3 = vld [vmem:[#allocation5 + $0xc4] ss:$8 sps:$4 sm:$0xff]   ;;  %v1098_v4 = vld [vmem:[#allocation5 + $0xc0] ss:$8 sps:$4 sm:$0xff]  }
  0x49   :  { %v1103_v5 = vld [vmem:[#allocation5 + $0xd4] ss:$8 sps:$4 sm:$0xff]   ;;  %v1101_v6 = vld [vmem:[#allocation5 + $0xd0] ss:$8 sps:$4 sm:$0xff]   ;;  %v257_v7 = vshrl.u32 %v1354_v27, 16  ;;  %v1113_v25 = vld [vmem:[#allocation7 + $0x8] sm:$0xff]  }
  0x4a   :  { %1005 = vmatpush3.bf16.msra.mxu1 %v1034_v8  ;;  %v1114_v26 = vld [vmem:[#allocation7 + $0x50] sm:$0xff]  }
  0x4b   :  { %1006 = vmatprep.subr.bf16.mxu1 %v1227_v0  ;;  %367 = vmatpush1.bf16.msra.mxu0 %v1044_v18  ;;  %v1368_v8 = vpack.i.b16 %v257_v7, %v257_v7  ;;  %v1106_v18 = vld [vmem:[#allocation5 + $0xe4] ss:$8 sps:$4 sm:$0xff]   ;;  %v1115_v27 = vld [vmem:[#allocation7 + $0x10] sm:$0xff]   ;;  %v846_v7 = vsub.s32 2, %v1356_v28 }
  0x4c   :  { %368 = vmatprep.subr.bf16.mxu0 %v1049_v19  ;;  %v1104_v19 = vld [vmem:[#allocation5 + $0xe0] ss:$8 sps:$4 sm:$0xff]  }
  0x4e   :  { %1007 = vmatpush3.bf16.msra.mxu1 %v1035_v9 }
  0x4f   :  { %1008 = vmatprep.subr.bf16.mxu1 %v1227_v0  ;;  %369 = vmatpush1.bf16.msra.mxu0 %v1047_v20  ;;  %v1109_v20 = vld [vmem:[#allocation5 + $0xf4] ss:$8 sps:$4 sm:$0xff]  }
  0x50   :  { %370 = vmatprep.subr.bf16.mxu0 %v1052_v21  ;;  %v1107_v21 = vld [vmem:[#allocation5 + $0xf0] ss:$8 sps:$4 sm:$0xff]  }
  0x52   :  { %1009 = vmatpush3.bf16.msra.mxu1 %v1036_v10 }
  0x53   :  { %1010 = vmatprep.subr.bf16.mxu1 %v1227_v0  ;;  %371 = vmatpush1.bf16.msra.mxu0 %v1050_v22  ;;  %v1092_v0 = vld [vmem:[#allocation5 + $0xa0] ss:$8 sps:$4 sm:$0xff]  }
  0x54   :  { %372 = vmatprep.subr.bf16.mxu0 %v1055_v23  ;;  %v1110_v22 = vld [vmem:[#allocation7 + $0x40] sm:$0xff]  }
  0x55   :  { %v1111_v23 = vld [vmem:[#allocation7] sm:$0xff]  }
  0x56   :  { %1011 = vmatpush3.bf16.msra.mxu1 %v1037_v11  ;;  %v263_v11 = vrot.slane %v1368_v8, %v147_v30  ;;  %v1116_v30 = vld [vmem:[#allocation7 + $0x58] sm:$0xff]  }
  0x57   :  { %373 = vmatpush1.bf16.msra.mxu0 %v1053_v24  ;;  %614 = vmatprep.subr.bf16.mxu1 %v1064_v44  ;;  %v1112_v24 = vld [vmem:[#allocation7 + $0x48] sm:$0xff]  }
  0x58   :  { %374 = vmatprep.subr.bf16.mxu0 %v1058_v39 }
  0x5b   :  { %375 = vmatpush1.bf16.msra.mxu0 %v1056_v40 }
  0x5c   :  { %376 = vmatprep.subr.bf16.mxu0 %v1061_v41 }
  0x5f   :  { %377 = vmatpush1.bf16.msra.mxu0 %v1059_v42 }
  0x60   :  { %966 = vmatprep.subr.bf16.mxu0 %v1110_v22 }
 0x114   :  { %v134_v31 = vpop.f32.mrb[0].mxu0 }
 0x115   :  { %v994_v32 = vpop.f32.mrb[1].mxu0 }
 0x116   :  { %v137_v34 = vpop.f32.mrb[2].mxu0  ;;  %v1118_v32 = vld [vmem:[#allocation7 + $0x60] sm:$0xff]  }
 0x117   :  { %v141_v35 = vpack.c.bf16 %v137_v34, %v134_v31  ;;  %v995_v36 = vpop.f32.mrb[3].mxu0  ;;  %v1117_v31 = vld [vmem:[#allocation7 + $0x18] sm:$0xff]   ;;  %v1120_v34 = vld [vmem:[#allocation7 + $0x68] sm:$0xff]  }
 0x119   :  { %v149_v37 = vadd.bf16 %v148_v33, %v141_v35  ;;  %v1119_v33 = vld [vmem:[#allocation7 + $0x20] sm:$0xff]   ;;  %v70_v35 = vld [vmem:[%s1407_s6 + $0x8] sm:$0xff]  ;;  %s1230_s6 = smov [#allocation8]  }
 0x11a   :  { %v72_v36 = vpack.c.bf16 %v70_v35, %v70_v35  ;;  %s863_s14 = sshll.u32 %s1230_s6, 4  ;;  %s864_s14 = int_to_ptr.vmem [resolvable:$true] %s863_s14 }
 0x11b   :  { %v150_v38 = vmax.bf16 %v1229_v12, %v149_v37  ;;  %v409_v37 = vsub.s32 1, %v1356_v28  ;;  %s1192_s16 = scalar_lea.vmem %s864_s14, 128  ;;  %p1197_p11 = scmp.lt.s32.totalorder %s864_s14, %s864_s14 }
 0x11c   :  { %p1193_p10 = scmp.ne.s32.totalorder %s864_s14, %s1192_s16  ;;  %p1198_p12 = scmp.lt.s32.totalorder %s1192_s16, %s1192_s16 }
 0x11d   :  { %1013 = vmatmul.mubr.bf16.vlgmr.msra.gmra.mrb[0].mxu1 %v150_v38  ;;  %v412_v38 = vpack.i.b16 %v72_v36, %v72_v36  ;;  %v410_v41 = vrot.slane %v1360_v29, %v409_v37 }
 0x11e   :  { %615 = vmatpush1.bf16.msra.mxu1 %v1062_v43  ;;  %p1199_p13 = por %p1198_p12, %p1197_p11 }
 0x11f   :  { %616 = vmatprep.subr.bf16.mxu1 %v1067_v45  ;;  %v417_v43 = vrot.slane %v412_v38, %v409_v37 }
 0x120   :  { %p1200_p0 = pnand %p1199_p13, %p1193_p10 }
 0x122   :  { %617 = vmatpush1.bf16.msra.mxu1 %v1065_v46 }
 0x123   :  { %618 = vmatprep.subr.bf16.mxu1 %v1070_v47 }
 0x126   :  { %619 = vmatpush1.bf16.msra.mxu1 %v1068_v48 }
 0x127   :  { %620 = vmatprep.subr.bf16.mxu1 %v1073_v49 }
 0x12a   :  { %621 = vmatpush1.bf16.msra.mxu1 %v1071_v50 }
 0x12b   :  { %622 = vmatprep.subr.bf16.mxu1 %v1076_v51  ;;  %v1121_v51 = vld [vmem:[#allocation7 + $0x28] sm:$0xff]  }
 0x12e   :  { %623 = vmatpush1.bf16.msra.mxu1 %v1074_v52  ;;  %v1122_v52 = vld [vmem:[#allocation7 + $0x70] sm:$0xff]  }
 0x12f   :  { %624 = vmatprep.subr.bf16.mxu1 %v1079_v53  ;;  %v1123_v53 = vld [vmem:[#allocation7 + $0x30] sm:$0xff]  }
 0x132   :  { %625 = vmatpush1.bf16.msra.mxu1 %v1077_v54  ;;  %v1124_v54 = vld [vmem:[#allocation7 + $0x78] sm:$0xff]  }
 0x133   :  { %626 = vmatprep.subr.bf16.mxu1 %v1082_v55  ;;  %v1125_v55 = vld [vmem:[#allocation7 + $0x38] sm:$0xff]  }
 0x136   :  { %627 = vmatpush1.bf16.msra.mxu1 %v1080_v56  ;;  %v663_v56 = vshrl.u32 %v72_v36, 16 }
 0x137   :  { %628 = vmatprep.subr.bf16.mxu1 %v1085_v57 }
 0x138   :  { %v664_v57 = vpack.i.b16 %v663_v56, %v663_v56 }
 0x13a   :  { %629 = vmatpush1.bf16.msra.mxu1 %v1083_v58 }
 0x13b   :  { %630 = vmatprep.subr.bf16.mxu1 %v1088_v59 }
 0x13e   :  { %631 = vmatpush1.bf16.msra.mxu1 %v1086_v60  ;;  %v662_v60 = vrot.slane %v1368_v8, %v409_v37 }
 0x13f   :  { %632 = vmatprep.subr.bf16.mxu1 %v1091_v61 }
 0x142   :  { %633 = vmatpush1.bf16.msra.mxu1 %v1089_v62  ;;  %v669_v62 = vrot.slane %v664_v57, %v409_v37 }
 0x143   :  { %634 = vmatprep.subr.bf16.mxu1 %v1094_v63 }
 0x146   :  { %635 = vmatpush1.bf16.msra.mxu1 %v1092_v0 }
 0x147   :  { %636 = vmatprep.subr.bf16.mxu1 %v1097_v1 }
 0x14a   :  { %637 = vmatpush1.bf16.msra.mxu1 %v1095_v2 }
 0x14b   :  { %638 = vmatprep.subr.bf16.mxu1 %v1100_v3 }
 0x14e   :  { %639 = vmatpush1.bf16.msra.mxu1 %v1098_v4 }
 0x14f   :  { %640 = vmatprep.subr.bf16.mxu1 %v1103_v5 }
 0x152   :  { %641 = vmatpush1.bf16.msra.mxu1 %v1101_v6 }
 0x153   :  { %642 = vmatprep.subr.bf16.mxu1 %v1106_v18 }
 0x156   :  { %643 = vmatpush1.bf16.msra.mxu1 %v1104_v19 }
 0x157   :  { %644 = vmatprep.subr.bf16.mxu1 %v1109_v20 }
 0x15a   :  { %645 = vmatpush1.bf16.msra.mxu1 %v1107_v21 }
 0x1f0   :  { %v249_v9 = vpop.f32.mrb[0].mxu1 }
 0x1f1   :  { %v1014_v10 = vpop.f32.mrb[1].mxu1 }
 0x1f2   :  { %v252_v13 = vpop.f32.mrb[2].mxu1 }
 0x1f3   :  { %v256_v14 = vpack.c.bf16 %v252_v13, %v249_v9  ;;  %v1015_v15 = vpop.f32.mrb[3].mxu1 }
 0x1f5   :  { %v264_v16 = vadd.bf16 %v263_v11, %v256_v14  ;;  %v847_v14 = vrot.slane %v1360_v29, %v846_v7 }
 0x1f7   :  { %v265_v17 = vmax.bf16 %v1229_v12, %v264_v16 }
 0x1f9   :  { %395 = vmatmul.mubr.bf16.vlgmr.msra.gmra.mrb[4].mxu0 %v265_v17 }
 0x1fa   :  { %967 = vmatpush3.bf16.msra.mxu0 %v1111_v23 }
 0x1fb   :  { %968 = vmatprep.subr.bf16.mxu0 %v1112_v24 }
 0x1fe   :  { %969 = vmatpush3.bf16.msra.mxu0 %v1113_v25 }
 0x1ff   :  { %970 = vmatprep.subr.bf16.mxu0 %v1114_v26 }
 0x202   :  { %971 = vmatpush3.bf16.msra.mxu0 %v1115_v27 }
 0x203   :  { %972 = vmatprep.subr.bf16.mxu0 %v1116_v30 }
 0x206   :  { %973 = vmatpush3.bf16.msra.mxu0 %v1117_v31 }
 0x207   :  { %974 = vmatprep.subr.bf16.mxu0 %v1118_v32 }
 0x20a   :  { %975 = vmatpush3.bf16.msra.mxu0 %v1119_v33 }
 0x20b   :  { %976 = vmatprep.subr.bf16.mxu0 %v1120_v34 }
 0x20e   :  { %977 = vmatpush3.bf16.msra.mxu0 %v1121_v51 }
 0x20f   :  { %978 = vmatprep.subr.bf16.mxu0 %v1122_v52 }
 0x212   :  { %979 = vmatpush3.bf16.msra.mxu0 %v1123_v53 }
 0x213   :  { %980 = vmatprep.subr.bf16.mxu0 %v1124_v54 }
 0x216   :  { %981 = vmatpush3.bf16.msra.mxu0 %v1125_v55 }
 0x2cc   :  { %v396_v39 = vpop.f32.mrb[4].mxu0 }
 0x2cd   :  { %v398_v40 = vpop.f32.mrb[5].mxu0 }
 0x2ce   :  { %v400_v42 = vpop.f32.mrb[6].mxu0 }
 0x2cf   :  { %v405_v44 = vpack.c.bf16 %v400_v42, %v396_v39  ;;  %v402_v45 = vpop.f32.mrb[7].mxu0 }
 0x2d0   :  { %v406_v46 = vpack.c.bf16 %v402_v45, %v398_v40 }
 0x2d1   :  { %v418_v47 = vadd.bf16 %v410_v41, %v405_v44 }
 0x2d2   :  { %v419_v48 = vadd.bf16 %v417_v43, %v406_v46 }
 0x2d3   :  { %v420_v50 = vmax.bf16 %v1229_v12, %v418_v47 }
 0x2d4   :  { %v421_v49 = vmax.bf16 %v1229_v12, %v419_v48 }
 0x2d6   :  { %646 = vmatprep.mubr.bf16.mxu1 %v421_v49 }
 0x2d7   :  { %647 = vmatmul.mubr.bf16.vlgmr.msra.gmra.mrb[4].mxu1 %v420_v50 }
 0x3aa   :  { %v648_v58 = vpop.f32.mrb[4].mxu1 }
 0x3ab   :  { %v650_v59 = vpop.f32.mrb[5].mxu1 }
 0x3ac   :  { %v652_v61 = vpop.f32.mrb[6].mxu1 }
 0x3ad   :  { %v657_v63 = vpack.c.bf16 %v652_v61, %v648_v58  ;;  %v654_v0 = vpop.f32.mrb[7].mxu1 }
 0x3ae   :  { %v658_v1 = vpack.c.bf16 %v654_v0, %v650_v59 }
 0x3af   :  { %v670_v2 = vadd.bf16 %v662_v60, %v657_v63 }
 0x3b0   :  { %v671_v3 = vadd.bf16 %v669_v62, %v658_v1 }
 0x3b1   :  { %v672_v5 = vmax.bf16 %v1229_v12, %v670_v2 }
 0x3b2   :  { %v673_v4 = vmax.bf16 %v1229_v12, %v671_v3 }
 0x3b4   :  { %834 = vmatprep.mubr.bf16.mxu0 %v673_v4 }
 0x3b5   :  { %835 = vmatmul.mubr.bf16.vlgmr.msra.gmra.mrb[8].mxu0 %v672_v5 }
 0x488   :  { %v982_v6 = vpop.f32.mrb[8].mxu0 }
 0x489   :  { %v983_v9 = vpop.f32.mrb[9].mxu0 }
 0x48a   :  { %v984_v10 = vadd.f32 %v983_v9, %v982_v6  ;;  %v985_v11 = vpop.f32.mrb[10].mxu0 }
 0x48b   :  { %v986_v8 = vpop.f32.mrb[11].mxu0 }
 0x48c   :  { %v987_v13 = vadd.f32 %v986_v8, %v985_v11 }
 0x48e   :  { %v843_v15 = vpack.c.bf16 %v987_v13, %v984_v10 }
 0x490   :  { %v848_v16 = vadd.bf16 %v847_v14, %v843_v15 }
 0x492   :  { %v952_v17 = vcombine.low %v848_v16, %v848_v16  ;;  %v953_v18 = vcombine.high %v848_v16, %v848_v16 }
 0x494   :  { %856 = vst [vmem:[#allocation8] sm:$0xf] %v952_v17  ;;  %857 = vst [vmem:[#allocation8 + $0x4] sm:$0xf] %v953_v18 }
 0x495   :  { %1203 = shalt.err (!%p1200_p0)
}
 0x496   :  { %s1204_s19 = scalar_lea.hbm %s1408_s7, 128 }
 0x497   :  { %p1205_p1 = scmp.ne.s32.totalorder %s1408_s7, %s1204_s19  ;;  %p1208_p2 = scmp.lt.u32.totalorder %s1204_s19, %s1408_s7 }
 0x499   :  { %p1210_p3 = pnand %p1208_p2, %p1205_p1 }
 0x49b   :  { %1213 = shalt.err (!%p1210_p3)
}
 0x49c   :  { %869 = dma.vmem_to_hbm [thread:$0]  %s864_s14, 128, %s1408_s7, [#allocation4], %s1225_s3, %s1225_s3, %s1226_s27  }
 0x49d   :  { %1218 = dma.done.wait [#allocation4], 128  }
 0x49e   :  { %1219 = vsyncadd [#allocation4], 4294967168 }
 0x49f   :  { %873 = vsyncpa [#allocation3], 1 }
 0x4a0   :  { %874 = vsyncpa [#allocation6], 1 }
 0x4a1   :  { %875 = vsyncpa [#allocation4], 1 }

</bundles_post_ra>
